<compile_context>
chip_gen: v5e
topology: v5e:2x2
jax: 0.10.0
libtpu: 0.0.40
codegen_flags: <defaults>
</compile_context>

<pallas_src>
import math
import numpy as np
import jax
import jax.numpy as jnp
from jax.experimental import pallas as pl
from jax.experimental.pallas import tpu as pltpu


def make_positional_encoding(d_model: int, max_len: int) -> jnp.ndarray:
    """Build the `pe` buffer exactly like the torch __init__ (note: log(max_len*2),
    matching the module spec rather than the canonical log(10000))."""
    position = np.arange(max_len, dtype=np.float32)[:, None]              # [max_len, 1]
    div_term = np.exp(
        np.arange(0, d_model, 2, dtype=np.float32)
        * (-math.log(max_len * 2) / d_model)
    )
    pe = np.zeros((max_len, 1, d_model), dtype=np.float32)
    sin_part = np.sin(position * div_term)
    cos_part = np.cos(position * div_term)
    pe[:, 0, 0::2] = sin_part
    n_odd = pe[:, 0, 1::2].shape[1]
    pe[:, 0, 1::2] = cos_part[:, :n_odd]     # mirrors the torch try/except for odd d_model
    return jnp.asarray(np.transpose(pe, (1, 0, 2)))                        # [1, max_len, d_model]


def _pe_add_kernel(x_ref, pe_ref, o_ref):
    # All refs share the identical block shape (1, TS, TD):
    # one vld + vld + vadd + vst per tile, no in-kernel broadcast or reshape.
    o_ref[...] = x_ref[...] + pe_ref[...]


def positional_encoding_forward(x: jnp.ndarray, pe: jnp.ndarray) -> jnp.ndarray:
    """Pallas implementation of PositionalEncoding.forward (dropout p=0.0 => identity)."""
    B, S, D = x.shape
    # Cast pe outside the kernel: halves pe HBM/VMEM traffic for bf16 x and
    # keeps the add free of dtype promotion.
    pe_slice = pe[:, :S, :].astype(x.dtype)                                 # (1, S, D)

    # Lane-density: TPU stores are unmasked only when the last block dim is a
    # multiple of 128. If D isn't 128-aligned but S*D is, fold (S, D) into
    # lane-dense rows of width L. Exact because pe broadcasts only over batch,
    # and the contiguous reshapes are free bitcasts.
    if D % 128 != 0 and (S * D) % 128 == 0:
        L = 128
        while (S * D) % (2 * L) == 0 and 2 * L <= 512:
            L *= 2
        R = (S * D) // L
        x_k = x.reshape(B, R, L)
        pe_k = pe_slice.reshape(1, R, L)
    else:
        R, L = S, D
        x_k, pe_k = x, pe_slice

    # Tile geometry: <=512 rows x (full or 1024-lane) blocks; block <= 4 MiB so
    # double-buffered x/out/pe stay <= ~24 MiB (fits v7x's 64 MiB VMEM).
    TS = R if R <= 512 else 512                  # multiple of 8, or full dim
    TD = L if L <= 2048 else 1024                # multiple of 128, or full dim
    grid = (pl.cdiv(R, TS), pl.cdiv(L, TD), B)   # batch innermost -> pe tile stays
                                                 # resident across the batch loop

    out = pl.pallas_call(
        _pe_add_kernel,
        out_shape=jax.ShapeDtypeStruct((B, R, L), x.dtype),
        grid=grid,
        in_specs=[
            pl.BlockSpec((1, TS, TD), lambda s, d, b: (b, s, d)),
            pl.BlockSpec((1, TS, TD), lambda s, d, b: (0, s, d)),
        ],
        out_specs=pl.BlockSpec((1, TS, TD), lambda s, d, b: (b, s, d)),
        compiler_params=pltpu.CompilerParams(
            dimension_semantics=("parallel", "parallel", "parallel"),
            vmem_limit_bytes=48 * 1024 * 1024,   # above v5e's 16 MiB default, below v7x physical
        ),
    )(x_k, pe_k)
    return out.reshape(B, S, D)


if __name__ == "__main__":
    batch, seq_len, d_model, max_len = 2, 8, 32, 16

    key = jax.random.PRNGKey(0)
    x = jax.random.normal(key, (batch, seq_len, d_model), dtype=jnp.float32)

    pe = make_positional_encoding(d_model, max_len)

    out = jax.block_until_ready(positional_encoding_forward(x, pe))

    # Reference: dropout p=0.0 is identity, so forward == x + pe[:, :seq_len, :].
    ref = x + pe[:, :seq_len, :]
    np.testing.assert_allclose(np.asarray(out), np.asarray(ref), rtol=1e-6, atol=1e-6)

    print("KERNEL_OK")
</pallas_src>

<mosaic_0001>
module attributes {stable_mosaic.version = 11 : i64} {
  func.func @_pe_add_kernel(%arg0: i32, %arg1: i32, %arg2: i32, %arg3: memref<1x1x256xf32, #tpu.memory_space<vmem>>, %arg4: memref<1x1x256xf32, #tpu.memory_space<vmem>>, %arg5: memref<1x1x256xf32, #tpu.memory_space<vmem>>) attributes {dimension_semantics = [#tpu.dimension_semantics<parallel>, #tpu.dimension_semantics<parallel>, #tpu.dimension_semantics<parallel>], iteration_bounds = array<i64: 1, 1, 2>, scalar_prefetch = 0 : i64, scratch_operands = 0 : i64, tpu.core_type = #tpu.core_type<tc>, window_params = [{transform_indices = @transform_0, window_bounds = array<i64: 1, 1, 256>}, {transform_indices = @transform_1, window_bounds = array<i64: 1, 1, 256>}, {transform_indices = @transform_2, window_bounds = array<i64: 1, 1, 256>}]} {
    %c0 = arith.constant 0 : index
    %c0_0 = arith.constant 0 : index
    %c0_1 = arith.constant 0 : index
    %0 = vector.load %arg3[%c0, %c0_0, %c0_1] : memref<1x1x256xf32, #tpu.memory_space<vmem>>, vector<1x1x256xf32>
    %c0_2 = arith.constant 0 : index
    %c0_3 = arith.constant 0 : index
    %c0_4 = arith.constant 0 : index
    %1 = vector.load %arg4[%c0_2, %c0_3, %c0_4] : memref<1x1x256xf32, #tpu.memory_space<vmem>>, vector<1x1x256xf32>
    %2 = arith.addf %0, %1 : vector<1x1x256xf32>
    %c0_5 = arith.constant 0 : index
    %c0_6 = arith.constant 0 : index
    %c0_7 = arith.constant 0 : index
    %3 = vector.load %arg5[%c0_5, %c0_6, %c0_7] : memref<1x1x256xf32, #tpu.memory_space<vmem>>, vector<1x1x256xf32>
    tpu.vector_store %arg5[%c0_5, %c0_6, %c0_7], %2 {strides = array<i32>} : memref<1x1x256xf32, #tpu.memory_space<vmem>>, vector<1x1x256xf32>,
    return
  }
  func.func @transform_0(%arg0: i32, %arg1: i32, %arg2: i32) -> (i32, i32, i32) {
    %c0_i32 = arith.constant 0 : i32
    return %arg2, %arg0, %arg1 : i32, i32, i32
  }
  func.func @transform_1(%arg0: i32, %arg1: i32, %arg2: i32) -> (i32, i32, i32) {
    %c0_i32 = arith.constant 0 : i32
    %c0_i32_0 = arith.constant 0 : i32
    return %c0_i32, %arg0, %arg1 : i32, i32, i32
  }
  func.func @transform_2(%arg0: i32, %arg1: i32, %arg2: i32) -> (i32, i32, i32) {
    %c0_i32 = arith.constant 0 : i32
    return %arg2, %arg0, %arg1 : i32, i32, i32
  }
}

</mosaic_0001>

<bundles_post_ra>
// kernel: tpu_custom_call.1
= control target key start
LH: loop header
LB: loop body
LE: loop exit
PB: predicated region body
PF: predicated region fallthrough
CT: control target
= control target key end

     0   :  { %7 = vsyncpa [#allocation3], 0  ;;  %s753_s0 = inlined_call_operand.hbm [shape: f32[2,1,256], index: 0, kind: input, shape index: {}]   ;;  %s754_s1 = inlined_call_operand.hbm [shape: f32[1,1,256], index: 1, kind: input, shape index: {}]   ;;  %s755_s2 = inlined_call_operand.hbm [shape: f32[2,1,256], index: 2, kind: output, shape index: {}]  }
   0x1   :  { %9 = vsyncpa [#allocation3 + $0x1], 0 }
   0x2   :  { %10 = vsyncpa [#allocation6], 0 }
   0x3   :  { %11 = vsyncpa [#allocation4], 0 }
   0x4   :  { %13 = vsyncpa [#allocation4 + $0x1], 0  ;;  %s604_s9 = smov 0   ;;  %s606_s10 = smov 0  }
   0x5   :  { %s608_s11 = smov 0   ;;  %s610_s12 = smov 0  }
   0x6   :  { %s612_s13 = smov 0   ;;  %s614_s14 = smov 0  }
   0x7 LB: > { %s352_s15 = sadd.s32 4294967295, %s586_s14   ;;  %s353_s16 = sadd.s32 4294967294, %s586_s14   ;;  %s586_s14 = sphi %s614_s14, %s19_s14   ;;  %s582_s13 = sphi %s612_s13, %s767_s13   ;;  %s578_s12 = sphi %s610_s12, %s766_s12   ;;  %s574_s11 = sphi %s608_s11, %s765_s11   ;;  %s570_s10 = sphi %s606_s10, %s764_s10   ;;  %s566_s9 = sphi %s604_s9, %s763_s9  }
   0x8   : > { %p62_p0 = scmp.ne.s32.totalorder %s570_s10, %s566_s9  ;;  %p638_p1 = scmp.eq.s32.totalorder %s352_s15, 0 }
   0x9   : > { %p642_p2 = scmp.eq.s32.totalorder %s352_s15, 1  ;;  %p124_p3 = scmp.eq.s32.totalorder %s353_s16, 1 }
   0xa   : > { %p648_p4 = por %p638_p1, %p62_p0  ;;  %p354_p5 = scmp.ge.s32.totalorder %s586_s14, 1 }
   0xb   : > { %p653_p6 = por %p124_p3, %p62_p0  ;;  %p131_p7 = scmp.lt.s32.totalorder %s586_s14, 3 }
   0xc   : > { %s147_s23 = sshll.u32 %s754_s1, 4  ;;  %p356_p9 = scmp.ge.s32.totalorder %s586_s14, 2  ;;  %s148_s23 = int_to_ptr.hbm [resolvable:$true] %s147_s23 }
   0xd   : > { %p661_p8 = pnand %p354_p5, %p131_p7  ;;  %s588_s25 = smov [#allocation5]  }
   0xe   : > { %s149_s26 = sshll.u32 %s588_s25, 4  ;;  %s31_s27 = sadd.s32 1, %s582_s13  ;;  %s150_s26 = int_to_ptr.vmem [resolvable:$true] %s149_s26 }
   0xf   : > { %p375_p10 = pneg %p661_p8  ;;  %p32_p12 = scmp.ge.s32.totalorder %s31_s27, 2 }
  0x10   : > { %s49_s28 = sadd.s32 1, %s574_s11  ;;  %p56_p13 = scmp.ne.s32.totalorder %s574_s11, %s570_s10 }
  0x11   : > { %p376_p11 = pnand %p375_p10, %p638_p1  ;;  %p57_p0 = scmp.eq.s32.totalorder %s586_s14, 0 }
  0x12   : > { %s769_s27 = smov (%p32_p12, %s31_s27), 0  ;;  %p683_p5 = por %p642_p2, %p56_p13 }
  0x13   : > { %378 = dma.hbm_to_vmem [thread:$0]  (!%p376_p11), %s148_s23, 32, %s150_s26, [#allocation6]  }
  0x14   : > { %p677_p3 = por %p57_p0, %p56_p13  ;;  %s42_s3 = ssub.s32 %s582_s13, %s769_s27 }
  0x15   : > { %p388_p7 = scmp.lt.s32.totalorder %s586_s14, 2  ;;  %p47_p10 = scmp.eq.s32.totalorder %s42_s3, 0 }
  0x16   : > { %s160_s4 = sand.u32 1, %s574_s11   ;;  %s358_s7 = sshll.u32 %s582_s13, 1 }
  0x17   : > { %s357_s5 = sshll.u32 %s160_s4, 1  ;;  %s172_s16 = scalar_lea.hbm %s753_s0, %s358_s7 }
  0x18   : > { %s692_s6 = scalar_select %p47_p10, %s574_s11, %s49_s28  }
  0x19   : > { %s164_s21 = scalar_lea.vmem [#allocation2], %s357_s5  ;;  %s174_s18 = sshll.u32 %s172_s16, 4  ;;  %s175_s18 = int_to_ptr.hbm [resolvable:$true] %s174_s18 }
  0x1a   : > { %s176_s22 = sshll.u32 %s164_s21, 4  ;;  %p380_p2 = pnand %p388_p7, %p677_p3  ;;  %s177_s22 = int_to_ptr.vmem [resolvable:$true] %s176_s22 }
  0x1b   : > { %s161_s23 = scalar_lea.sflag [#allocation3], %s160_s4  ;;  %185 = sbr.rel (%p661_p8) target bundleno = 50 (0x32), region = 28 }
  0x1c   : > { %382 = dma.hbm_to_vmem [thread:$0]  (!%p380_p2), %s175_s18, 32, %s177_s22, %s161_s23  }
  0x1d   : > { %s703_s25 = sand.u32 (!%p661_p8), 1, %s570_s10  }
  0x1e   : > { %s360_s26 = sshll.u32 (!%p661_p8), %s703_s25, 1  ;;  %s188_s28 = scalar_lea.sflag (!%p661_p8), [#allocation3], %s703_s25 }
  0x1f   : > { %s191_s3 = scalar_lea.vmem (!%p661_p8), [#allocation2], %s360_s26 }
  0x20   : > { %553 = dma.done.wait (%p648_p4), %s188_s28, 32  }
  0x21   : > { %555 = vsyncadd (%p648_p4), %s188_s28, 4294967264 }
  0x22   : > { %557 = dma.done.wait (%p638_p1), [#allocation6], 32  }
  0x23   : > { %559 = vsyncadd (%p638_p1), [#allocation6], 4294967264  ;;  %s364_s24 = sshll.u32 %s578_s12, 1  ;;  %v224_v0 = vlaneseq  ;;  %s217_s7 = scalar_lea.vmem [#allocation7], %s360_s26  ;;  %v221_v1 = vld [vmem:[%s191_s3] sm:$0x3] }
  0x24   : > { %s244_s5 = scalar_lea.hbm %s755_s2, %s364_s24  ;;  %s246_s8 = sshll.u32 %s217_s7, 4  ;;  %v222_v2 = vld [vmem:[#allocation5] sm:$0x3]  ;;  %s247_s8 = int_to_ptr.vmem [resolvable:$true] %s246_s8 }
  0x25   : > { %s248_s15 = sshll.u32 %s244_s5, 4  ;;  %vm226_vm0 = vcmp.lt.s32.totalorder %v224_v0, 256  ;;  %v223_v3 = vadd.f32 %v222_v2, %v221_v1  ;;  %s230_s17 = scalar_lea.sflag [#allocation4], %s703_s25  ;;  %s249_s15 = int_to_ptr.hbm [resolvable:$true] %s248_s15 }
  0x26   : > { %s514_s19 = sshra.s32 %s249_s15, 4  ;;  %s520_s22 = scalar_lea.hbm %s755_s2, 4  ;;  %s515_s19 = int_to_ptr.hbm [resolvable:$true] %s514_s19 }
  0x27   : > { %228 = vst.msk [vmem:[%s217_s7] sm:$0x3] %vm226_vm0, %v223_v3  ;;  %s516_s12 = scalar_lea.hbm %s515_s19, 2  ;;  %p521_p11 = scmp.lt.s32.totalorder %s515_s19, %s755_s2 }
  0x28   : > { %p517_p1 = scmp.ne.s32.totalorder %s515_s19, %s516_s12  ;;  %p522_p12 = scmp.lt.s32.totalorder %s520_s22, %s516_s12 }
  0x2a   : > { %p518_p4 = pnand %p517_p1, %p683_p5  ;;  %p523_p13 = por %p522_p12, %p521_p11 }
  0x2c   : > { %p519_p8 = pneg %p518_p4 }
  0x2e   : > { %p524_p0 = pnand %p523_p13, %p519_p8 }
  0x30   : > { %527 = shalt.err (!%p524_p0)
}
  0x31   : > { %373 = dma.vmem_to_hbm [thread:$0]  (%p683_p5), %s247_s8, 32, %s249_s15, %s230_s17  }
  0x32 PF: > { %s260_s25 = sand.u32 1, %s566_s9   ;;  %p384_p3 = pnand %p356_p9, %p653_p6 }
  0x33   : > { %s261_s26 = scalar_lea.sflag [#allocation4], %s260_s25 }
  0x34   : > { %p385_p7 = pneg %p384_p3 }
  0x36   : > { %561 = dma.done.wait (%p385_p7), %s261_s26, 32  }
  0x37   : > { %563 = vsyncadd (%p385_p7), %s261_s26, 4294967264  ;;  %s19_s14 = sadd.s32 1, %s586_s14   ;;  %s763_s9 = smov %s570_s10 }
  0x38   : > { %p16_p10 = scmp.ge.s32.totalorder %s19_s14, 4   ;;  %s764_s10 = smov %s574_s11 }
  0x39   : > { %s765_s11 = smov %s692_s6  ;;  %s766_s12 = smov %s582_s13 }
  0x3a   : > { %s767_s13 = smov %s769_s27  ;;  %18 = sbr.rel (!%p16_p10) target bundleno = 7 (0x7), region = 78 }
  0x3f   :  { %267 = vsyncpa [#allocation3], 1 }
  0x40   :  { %269 = vsyncpa [#allocation3 + $0x1], 1 }
  0x41   :  { %270 = vsyncpa [#allocation6], 1 }
  0x42   :  { %271 = vsyncpa [#allocation4], 1 }
  0x43   :  { %273 = vsyncpa [#allocation4 + $0x1], 1 }

</bundles_post_ra>
